<compile_context>
chip_gen: v6e
topology: v6e:2x2x1
jax: 0.10.0
libtpu: 0.0.40
codegen_flags: <defaults>
</compile_context>

<pallas_src>
import functools

import jax
import jax.numpy as jnp
from jax import lax
from jax.experimental import pallas as pl
from jax.experimental.pallas import tpu as pltpu

EPSILON = 1e-6

_COL_TILE = 256            # streamed j tile: 256-wide Gram feeds v6e/v7x 2x256^2 MXU
_MAX_ROW_TILE = 1024       # cap on resident i rows
_ROW_TILE_BYTES = 4 << 20  # single-buffer VMEM budget for the resident i tile
_VMEM_LIMIT = 48 << 20     # explicit scoped-VMEM limit (under v7x 64 MiB physical)


def _round_up(x, m):
    return ((x + m - 1) // m) * m


def _cdiv(a, b):
    return (a + b - 1) // b


def _normalize_kernel(x_ref, xn_ref, sq_ref):
    """O(B*D) pre-pass: row-normalize once, emit xn (MXU dtype) + ||xn||^2."""
    x = x_ref[...].astype(jnp.float32)
    norm = jnp.sqrt(jnp.sum(x * x, axis=1, keepdims=True))
    xn = x / (norm + EPSILON)
    xn_ref[...] = xn.astype(xn_ref.dtype)
    sq_ref[...] = jnp.sum(xn * xn, axis=1, keepdims=True)


def _pair_dist_kernel(xi_ref, xj_ref, sqi_ref, sqj_ref, dist_ref, acc_scr,
                      *, batch, ti, tj, padded):
    """Grid = (i resident row-block ["parallel"], j streamed col-block ["arbitrary"]).

    Distances between block i and block j via the Gram identity
    ||a-b||^2 = |a|^2 + |b|^2 - 2 a.b (one [Ti,D]x[D,Tj] MXU matmul per step);
    per-row sums accumulate in VMEM scratch and flush once at the last j."""
    i = pl.program_id(0)
    j = pl.program_id(1)
    nj = pl.num_programs(1)

    @pl.when(j == 0)
    def _():
        acc_scr[...] = jnp.zeros_like(acc_scr)

    # Gram matrix on the MXU (contract the feature axis; f32 accumulation).
    g = lax.dot_general(
        xi_ref[...], xj_ref[...],
        dimension_numbers=(((1,), (1,)), ((), ())),
        preferred_element_type=jnp.float32)                       # [Ti, Tj]

    d2 = sqi_ref[...] + jnp.transpose(sqj_ref[...]) - 2.0 * g
    dist = jnp.sqrt(jnp.maximum(d2, 0.0))   # fp cancellation can go slightly < 0
    # TODO(synk): forward-only; a future VJP would need an eps / diagonal mask on
    # the sqrt to avoid inf gradients at zero distance.

    i_lo = i * ti
    j_lo = j * tj
    # Mask only where needed: tiles touching the diagonal (exact zeros there) or
    # the padded tail rows/cols; interior tiles skip the per-element mask ops.
    need_mask = (i_lo < j_lo + tj) & (j_lo < i_lo + ti)
    if padded:
        need_mask = need_mask | (i_lo + ti > batch) | (j_lo + tj > batch)

    @pl.when(need_mask)
    def _():
        row = i_lo + lax.broadcasted_iota(jnp.int32, (ti, tj), 0)
        col = j_lo + lax.broadcasted_iota(jnp.int32, (ti, tj), 1)
        keep = row != col                       # exact zero on the diagonal
        if padded:
            keep = keep & (row < batch) & (col < batch)
        acc_scr[...] += jnp.sum(jnp.where(keep, dist, 0.0), axis=1, keepdims=True)

    @pl.when(jnp.logical_not(need_mask))
    def _():
        acc_scr[...] += jnp.sum(dist, axis=1, keepdims=True)

    @pl.when(j == nj - 1)
    def _():
        dist_ref[...] = acc_scr[...]


def enhanced_isotropy_maximization_loss(embeddings):
    """embeddings: [batch, embedding_dim] float array -> scalar float32 loss."""
    assert embeddings.ndim == 2
    b, d = embeddings.shape

    # Keep DMA/MXU in the native dtype: bf16 inputs use the bf16 MXU path with
    # f32 accumulation; f32 inputs stay f32 to match the reference tightly.
    mxu_dtype = jnp.bfloat16 if embeddings.dtype == jnp.bfloat16 else jnp.float32
    bpe = 2 if mxu_dtype == jnp.bfloat16 else 4

    # Streamed (j) tile: MXU-friendly 256 rows, shrunk (8-aligned) for tiny batches.
    tj = min(_COL_TILE, _round_up(b, 8))

    # Resident (i) tile: as many tj-chunks as the VMEM budget allows, never more
    # than the batch needs, and capped so nbi >= 2 (v7x megacore) when there is
    # more than one column block.
    nbj_needed = _cdiv(b, tj)
    by_vmem = max(1, _ROW_TILE_BYTES // max(1, tj * d * bpe))
    by_cap = max(1, _MAX_ROW_TILE // tj)
    blocks_per_i = max(1, min(by_vmem, by_cap, nbj_needed))
    if nbj_needed >= 2:
        blocks_per_i = min(blocks_per_i, max(1, nbj_needed // 2))
    ti = blocks_per_i * tj
    # TODO(synk): for very large embedding dims (d*tj*bpe >> 4 MiB) a feature-axis
    # (K) grid dimension with a Gram accumulator would bound VMEM further.

    b_pad = _round_up(b, ti)      # multiple of ti, hence of tj
    nbi = b_pad // ti
    nbj = b_pad // tj
    padded = b_pad != b

    x = embeddings
    if padded:
        x = jnp.pad(x, ((0, b_pad - b), (0, 0)))   # zero rows; masked in-kernel

    # Pass 1: normalize once (O(B*D)).
    xn, sq = pl.pallas_call(
        _normalize_kernel,
        out_shape=[
            jax.ShapeDtypeStruct((b_pad, d), mxu_dtype),   # normalized rows
            jax.ShapeDtypeStruct((b_pad, 1), jnp.float32), # squared row norms
        ],
        grid_spec=pltpu.PrefetchScalarGridSpec(
            num_scalar_prefetch=0,
            grid=(nbj,),
            in_specs=[pl.BlockSpec((tj, d), lambda i: (i, 0))],
            out_specs=[pl.BlockSpec((tj, d), lambda i: (i, 0)),
                       pl.BlockSpec((tj, 1), lambda i: (i, 0))],
        ),
        compiler_params=pltpu.CompilerParams(
            dimension_semantics=("parallel",),
            vmem_limit_bytes=_VMEM_LIMIT),
    )(x)

    # Pass 2: pairwise distances (O(B^2*D) on the MXU via the Gram identity).
    pair_kernel = functools.partial(
        _pair_dist_kernel, batch=b, ti=ti, tj=tj, padded=padded)
    dist_rows = pl.pallas_call(
        pair_kernel,
        out_shape=jax.ShapeDtypeStruct((b_pad, 1), jnp.float32),
        grid_spec=pltpu.PrefetchScalarGridSpec(
            num_scalar_prefetch=0,
            grid=(nbi, nbj),
            in_specs=[
                pl.BlockSpec((ti, d), lambda i, j: (i, 0)),  # resident i rows
                pl.BlockSpec((tj, d), lambda i, j: (j, 0)),  # streamed j rows
                pl.BlockSpec((ti, 1), lambda i, j: (i, 0)),  # |x_i|^2
                pl.BlockSpec((tj, 1), lambda i, j: (j, 0)),  # |x_j|^2
            ],
            out_specs=pl.BlockSpec((ti, 1), lambda i, j: (i, 0)),
            scratch_shapes=[pltpu.VMEM((ti, 1), jnp.float32)],
        ),
        compiler_params=pltpu.CompilerParams(
            dimension_semantics=("parallel", "arbitrary"),
            vmem_limit_bytes=_VMEM_LIMIT),
    )(xn, xn, sq, sq)

    # Cheap O(B*D) epilogue (padded rows are exact zeros in xn, sq and dist_rows).
    col_mean = jnp.sum(xn.astype(jnp.float32), axis=0) / b
    total_sq = jnp.sum(sq)
    diag_var_mean = (total_sq - b * jnp.sum(col_mean * col_mean)) / d
    mean_dist = jnp.sum(dist_rows) / (b * b)
    return 1.0 / diag_var_mean + jnp.log(mean_dist)


def _reference_loss(embeddings):
    # Pure-JAX reference mirroring the PyTorch forward (for correctness check).
    x = embeddings.astype(jnp.float32)
    x = x / (jnp.linalg.norm(x, axis=1, keepdims=True) + EPSILON)
    c = x - jnp.mean(x, axis=0, keepdims=True)
    diag_var = jnp.diagonal(c.T @ c)
    dist = jnp.linalg.norm(c[:, None, :] - c[None, :, :], axis=2)
    return 1.0 / jnp.mean(diag_var) + jnp.log(jnp.mean(dist))


if __name__ == "__main__":
    key = jax.random.PRNGKey(0)
    k1, k2, k3 = jax.random.split(key, 3)

    # Small single-block case, no padding.
    x_small = jax.random.normal(k1, (8, 32), dtype=jnp.float32)
    loss_small = jax.block_until_ready(enhanced_isotropy_maximization_loss(x_small))
    ref_small = jax.block_until_ready(_reference_loss(x_small))
    assert jnp.allclose(loss_small, ref_small, rtol=1e-4, atol=1e-5), (loss_small, ref_small)

    # Multi-block (i, j) grid with padding, edge masking and j-sweep accumulation.
    x_tiled = jax.random.normal(k2, (300, 64), dtype=jnp.float32)
    loss_tiled = jax.block_until_ready(enhanced_isotropy_maximization_loss(x_tiled))
    ref_tiled = jax.block_until_ready(_reference_loss(x_tiled))
    assert jnp.allclose(loss_tiled, ref_tiled, rtol=1e-4, atol=1e-5), (loss_tiled, ref_tiled)

    # bf16 inputs exercise the bf16 MXU path (looser tolerance: Gram cancellation).
    x_bf16 = jax.random.normal(k3, (200, 96), dtype=jnp.float32).astype(jnp.bfloat16)
    loss_bf16 = jax.block_until_ready(enhanced_isotropy_maximization_loss(x_bf16))
    ref_bf16 = jax.block_until_ready(_reference_loss(x_bf16))
    assert jnp.allclose(loss_bf16, ref_bf16, rtol=5e-2, atol=5e-2), (loss_bf16, ref_bf16)

    print("KERNEL_OK")
</pallas_src>

<mosaic_0001>
module attributes {stable_mosaic.version = 11 : i64} {
  func.func @_normalize_kernel(%arg0: i32, %arg1: memref<8x32xf32, #tpu.memory_space<vmem>>, %arg2: memref<8x32xf32, #tpu.memory_space<vmem>>, %arg3: memref<8x1xf32, #tpu.memory_space<vmem>>) attributes {dimension_semantics = [#tpu.dimension_semantics<parallel>], iteration_bounds = array<i64: 1>, scalar_prefetch = 0 : i64, scratch_operands = 0 : i64, tpu.core_type = #tpu.core_type<tc>, window_params = [{transform_indices = @transform_0, window_bounds = array<i64: 8, 32>}, {transform_indices = @transform_1, window_bounds = array<i64: 8, 32>}, {transform_indices = @transform_2, window_bounds = array<i64: 8, 1>}]} {
    %c0 = arith.constant 0 : index
    %c0_0 = arith.constant 0 : index
    %0 = vector.load %arg1[%c0, %c0_0] : memref<8x32xf32, #tpu.memory_space<vmem>>, vector<8x32xf32>
    %1 = arith.mulf %0, %0 : vector<8x32xf32>
    %cst = arith.constant dense<0.000000e+00> : vector<8xf32>
    %2 = vector.multi_reduction <add>, %1, %cst [1] : vector<8x32xf32> to vector<8xf32>
    %3 = vector.shape_cast %2 : vector<8xf32> to vector<8x1xf32>
    %4 = math.sqrt %3 : vector<8x1xf32>
    %cst_1 = arith.constant 9.99999997E-7 : f32
    %5 = vector.broadcast %cst_1 : f32 to vector<8x1xf32>
    %6 = arith.addf %4, %5 : vector<8x1xf32>
    %7 = vector.broadcast %6 : vector<8x1xf32> to vector<8x32xf32>
    %8 = arith.divf %0, %7 : vector<8x32xf32>
    %c0_2 = arith.constant 0 : index
    %c0_3 = arith.constant 0 : index
    %9 = vector.load %arg2[%c0_2, %c0_3] : memref<8x32xf32, #tpu.memory_space<vmem>>, vector<8x32xf32>
    tpu.vector_store %arg2[%c0_2, %c0_3], %8 {strides = array<i32>} : memref<8x32xf32, #tpu.memory_space<vmem>>, vector<8x32xf32>,
    %10 = arith.mulf %8, %8 : vector<8x32xf32>
    %cst_4 = arith.constant dense<0.000000e+00> : vector<8xf32>
    %11 = vector.multi_reduction <add>, %10, %cst_4 [1] : vector<8x32xf32> to vector<8xf32>
    %12 = vector.shape_cast %11 : vector<8xf32> to vector<8x1xf32>
    %c0_5 = arith.constant 0 : index
    %c0_6 = arith.constant 0 : index
    %13 = vector.load %arg3[%c0_5, %c0_6] : memref<8x1xf32, #tpu.memory_space<vmem>>, vector<8x1xf32>
    tpu.vector_store %arg3[%c0_5, %c0_6], %12 {strides = array<i32>} : memref<8x1xf32, #tpu.memory_space<vmem>>, vector<8x1xf32>,
    return
  }
  func.func @transform_0(%arg0: i32) -> (i32, i32) {
    %c0_i32 = arith.constant 0 : i32
    %c0_i32_0 = arith.constant 0 : i32
    return %arg0, %c0_i32 : i32, i32
  }
  func.func @transform_1(%arg0: i32) -> (i32, i32) {
    %c0_i32 = arith.constant 0 : i32
    %c0_i32_0 = arith.constant 0 : i32
    return %arg0, %c0_i32 : i32, i32
  }
  func.func @transform_2(%arg0: i32) -> (i32, i32) {
    %c0_i32 = arith.constant 0 : i32
    %c0_i32_0 = arith.constant 0 : i32
    return %arg0, %c0_i32 : i32, i32
  }
}

</mosaic_0001>

<bundles_post_ra>
// kernel: tpu_custom_call.1
= control target key start
LH: loop header
LB: loop body
LE: loop exit
PB: predicated region body
PF: predicated region fallthrough
CT: control target
= control target key end

     0   :  { %8 = vsyncpa [#allocation3], 0  ;;  %s144_s0 = inlined_call_operand.hbm [shape: f32[8,32], index: 0, kind: input, shape index: {}]   ;;  %s145_s1 = inlined_call_operand.hbm [shape: f32[8,32], index: 1, kind: output, shape index: {0}]   ;;  %s146_s2 = inlined_call_operand.vmem [shape: f32[8,1], index: 2, kind: output, shape index: {1}]  }
   0x1   :  { %9 = vsyncpa [#allocation4], 0  ;;  %s115_s9 = smov [#allocation2]  }
   0x2   :  { %s16_s10 = sshll.u32 %s115_s9, 4  ;;  %s17_s10 = int_to_ptr.vmem [resolvable:$true] %s16_s10 }
   0x3   :  { %s79_s11 = scalar_lea.vmem %s17_s10, 128  ;;  %p84_p1 = scmp.lt.s32.totalorder %s17_s10, %s17_s10 }
   0x4   :  { %p80_p0 = scmp.ne.s32.totalorder %s17_s10, %s79_s11  ;;  %p85_p2 = scmp.lt.s32.totalorder %s79_s11, %s79_s11 }
   0x6   :  { %p86_p3 = por %p85_p2, %p84_p1 }
   0x8   :  { %p87_p4 = pnand %p86_p3, %p80_p0 }
   0xa   :  { %90 = shalt.err (!%p87_p4)
}
   0xb   :  { %19 = dma.hbm_to_vmem [thread:$0]  %s144_s0, 128, %s17_s10, [#allocation3]  }
   0xc   :  { %111 = dma.done.wait [#allocation3], 128  }
   0xd   :  { %112 = vsyncadd [#allocation3], 4294967168  ;;  %v23_v0 = vld [vmem:[#allocation2] sm:$0xff]  ;;  %vm25_vm0 = vcmask 261120   ;;  %s116_s0 = smov [#allocation5]  }
   0xe   :  { %v24_v1 = vmul.f32 %v23_v0, %v23_v0  ;;  %s52_s14 = sshll.u32 %s116_s0, 4  ;;  %s53_s14 = int_to_ptr.vmem [resolvable:$true] %s52_s14 }
   0xf   :  { %s91_s15 = scalar_lea.vmem %s53_s14, 128  ;;  %p96_p6 = scmp.lt.s32.totalorder %s53_s14, %s53_s14 }
  0x10   :  { %v26_v2 = vsel %vm25_vm0, %v24_v1, 0.0  ;;  %p92_p5 = scmp.ne.s32.totalorder %s53_s14, %s91_s15  ;;  %p97_p7 = scmp.lt.s32.totalorder %s91_s15, %s91_s15 }
  0x11   :  { %27 = vadd.xlane.f32.xlu0 %v26_v2 }
  0x12   :  { %p98_p8 = por %p97_p7, %p96_p6 }
  0x14   :  { %p99_p9 = pnand %p98_p8, %p92_p5 }
  0x9a   :  { %v28_v3 = vpop.xlane.xlu0 %27 }
  0x9b   :  { %67 = vrsqrt.f32 %v28_v3  ;;  %vm31_vm1 = vcmp.eq.f32.partialorder %v28_v3, inf  ;;  %v34_v6 = vand.u32 2147483648, %v28_v3  ;;  %vm33_vm2 = vcmp.eq.f32.partialorder %v28_v3, 0.0 }
  0xa8   :  { %v68_v4 = vpop.eup %67 }
  0xa9   :  { %v30_v5 = vmul.f32 %v68_v4, %v28_v3 }
  0xab   :  { %v32_v7 = vsel %vm31_vm1, %v28_v3, %v30_v5 }
  0xac   :  { %v35_v8 = vsel %vm33_vm2, %v34_v6, %v32_v7 }
  0xad   :  { %v36_v9 = vadd.f32 1e-06, %v35_v8 }
  0xaf   :  { %69 = vrcp.f32 %v36_v9 }
  0xbc   :  { %v70_v10 = vpop.eup %69 }
  0xbd   :  { %v38_v11 = vmul.f32 %v70_v10, %v23_v0 }
  0xbf   :  { %v40_v12 = vmul.f32 %v38_v11, %v38_v11  ;;  %39 = vst.msk [vmem:[#allocation5] sm:$0xff] %vm25_vm0, %v38_v11 }
  0xc1   :  { %v41_v13 = vsel %vm25_vm0, %v40_v12, 0.0 }
  0xc2   :  { %42 = vadd.xlane.f32.xlu0 %v41_v13 }
  0xc3   :  { %102 = shalt.err (!%p99_p9)
}
  0xc4   :  { %55 = dma.vmem_to_hbm [thread:$0]  %s53_s14, 128, %s145_s1, [#allocation4]   ;;  %vm44_vm3 = vcmask 7168  }
 0x14b   :  { %v43_v14 = vpop.xlane.xlu0 %42 }
 0x14c   :  { %45 = vst.msk [vmem:[%s146_s2] sm:$0xff] %vm44_vm3, %v43_v14 }
 0x14d   :  { %113 = dma.done.wait [#allocation4], 128  }
 0x14e   :  { %114 = vsyncadd [#allocation4], 4294967168 }
 0x14f   :  { %63 = vsyncpa [#allocation3], 1 }
 0x150   :  { %64 = vsyncpa [#allocation4], 1 }

</bundles_post_ra>
